<compile_context>
chip_gen: v6e
topology: v6e:2x2x1
jax: 0.10.0
libtpu: 0.0.40
codegen_flags: <defaults>
</compile_context>

<pallas_src>
import math
import functools

import jax
import jax.numpy as jnp
from jax import lax
from jax.experimental import pallas as pl
from jax.experimental.pallas import tpu as pltpu


ACT_DTYPE = jnp.bfloat16          # storage dtype for weights / activations
MXU_DTYPE = jnp.bfloat16          # matmul operand dtype (f32 accumulation)
VMEM_LIMIT = 48 * 1024 * 1024     # leaves headroom under v7x's 64 MiB VMEM


def _round_up(x, m):
    return ((x + m - 1) // m) * m


def _pick_tile(padded, maximum=1024):
    """Largest tile in {1024,512,256,128} (<= maximum) dividing `padded`."""
    if padded <= maximum:
        return padded
    for t in (1024, 512, 256, 128):
        if t <= maximum and padded % t == 0:
            return t
    return 128


# ---------------------------------------------------------------------------
# Fused tiled linear:  [LayerNorm ->] x @ w [+ bias] [QuickGELU] [+ residual]
# ---------------------------------------------------------------------------

def _linear_kernel(*refs, nk, inv_k, activation, has_ln, ln_eps, has_bias,
                   has_residual):
    it = iter(refs)
    x_ref = next(it)
    w_ref = next(it)
    g_ref = b_ln_ref = b_ref = r_ref = None
    if has_ln:
        g_ref = next(it)
        b_ln_ref = next(it)
    if has_bias:
        b_ref = next(it)
    if has_residual:
        r_ref = next(it)
    o_ref = next(it)
    acc_ref = next(it) if nk > 1 else None
    xln_ref = next(it) if has_ln else None

    j = pl.program_id(1)
    k = pl.program_id(2)

    if has_ln:
        # LN of the x row-block is identical for every output (j) tile:
        # compute once per i-block (at j == 0) into a VMEM cache, reuse after.
        # nk == 1 is guaranteed on this path (the whole row is one K block).
        @pl.when(j == 0)
        def _compute_ln():
            xf = x_ref[...].astype(jnp.float32)
            mean = jnp.sum(xf, axis=-1, keepdims=True) * inv_k
            d = xf - mean                          # stable two-pass variance
            var = jnp.sum(d * d, axis=-1, keepdims=True) * inv_k
            y = d * lax.rsqrt(var + ln_eps)
            y = (y * g_ref[...].astype(jnp.float32)
                 + b_ln_ref[...].astype(jnp.float32))
            xln_ref[...] = y.astype(MXU_DTYPE)

        xv = xln_ref[...]
    else:
        xv = x_ref[...].astype(MXU_DTYPE)

    def _epilogue(y):
        if has_bias:
            y = y + b_ref[...].astype(jnp.float32)
        if activation == "quick_gelu":             # CLIP QuickGELU
            y = y * jax.nn.sigmoid(1.702 * y)
        if has_residual:
            y = y + r_ref[...].astype(jnp.float32)
        o_ref[...] = y.astype(o_ref.dtype)

    partial = jnp.dot(xv, w_ref[...].astype(MXU_DTYPE),
                      preferred_element_type=jnp.float32)

    if nk == 1:
        _epilogue(partial)                         # no accumulator round-trip
    else:
        @pl.when(k == 0)
        def _init():
            acc_ref[...] = jnp.zeros_like(acc_ref)

        acc_ref[...] += partial

        @pl.when(k == nk - 1)
        def _finalize():
            _epilogue(acc_ref[...])


def pallas_linear(x, w, bias=None, *, activation=None, residual=None,
                  ln_params=None, out_dtype=None, ln_eps=1e-5):
    """y = [residual +] act( [LN(x)] @ w [+ bias] ).  x:(M,K) w:(K,N)."""
    M, K = x.shape
    N = w.shape[1]
    out_dtype = out_dtype or ACT_DTYPE

    has_ln = ln_params is not None
    has_bias = bias is not None
    has_residual = residual is not None

    # --- tile selection / padding -------------------------------------------
    Mp = M if M < 8 else _round_up(M, 8)
    if Mp <= 512:
        tm = Mp                                    # single i tile: weights stream once
    else:
        tm = 512
        Mp = _round_up(Mp, tm)
    Np = _round_up(N, 128)                         # lane-dense output stores
    tn = _pick_tile(Np, 1024)
    if has_ln or K <= 1024:
        Kp, tk, nk = K, K, 1                       # LN needs the full row in one block
    else:
        Kp = _round_up(K, 128)
        tk = _pick_tile(Kp, 1024)
        nk = Kp // tk

    xp = x if (Mp == M and Kp == K) else jnp.pad(x, ((0, Mp - M), (0, Kp - K)))
    wp = w if (Kp == K and Np == N) else jnp.pad(w, ((0, Kp - K), (0, Np - N)))

    operands = [xp, wp]
    if nk >= 3:
        # deeper weight-stream buffering for k-streamed (large-K) matmuls
        w_spec = pl.BlockSpec((tk, tn), lambda i, j, k: (k, j),
                              pipeline_mode=pl.Buffered(3))
    else:
        w_spec = pl.BlockSpec((tk, tn), lambda i, j, k: (k, j))
    in_specs = [pl.BlockSpec((tm, tk), lambda i, j, k: (i, k)), w_spec]
    if has_ln:
        g, b_ln = ln_params
        operands += [g.reshape(1, K), b_ln.reshape(1, K)]
        in_specs += [pl.BlockSpec((1, K), lambda i, j, k: (0, 0)),
                     pl.BlockSpec((1, K), lambda i, j, k: (0, 0))]
    if has_bias:
        bp = bias if Np == N else jnp.pad(bias, (0, Np - N))
        operands.append(bp.reshape(1, Np))
        in_specs.append(pl.BlockSpec((1, tn), lambda i, j, k: (0, j)))
    if has_residual:
        rp = residual if (Mp == M and Np == N) else jnp.pad(
            residual, ((0, Mp - M), (0, Np - N)))
        operands.append(rp)
        in_specs.append(pl.BlockSpec((tm, tn), lambda i, j, k: (i, j)))

    scratch = []
    if nk > 1:
        scratch.append(pltpu.VMEM((tm, tn), jnp.float32))
    if has_ln:
        scratch.append(pltpu.VMEM((tm, Kp), MXU_DTYPE))     # LN'd-x cache

    kernel = functools.partial(
        _linear_kernel, nk=nk, inv_k=1.0 / K, activation=activation,
        has_ln=has_ln, ln_eps=ln_eps, has_bias=has_bias,
        has_residual=has_residual)

    # j must stay sequential per core when the LN'd-x cache is used.
    dims = (("parallel", "arbitrary", "arbitrary") if has_ln
            else ("parallel", "parallel", "arbitrary"))

    out = pl.pallas_call(
        kernel,
        grid=(Mp // tm, Np // tn, nk),
        in_specs=in_specs,
        out_specs=pl.BlockSpec((tm, tn), lambda i, j, k: (i, j)),
        out_shape=jax.ShapeDtypeStruct((Mp, Np), out_dtype),
        scratch_shapes=scratch,
        compiler_params=pltpu.CompilerParams(
            dimension_semantics=dims,
            vmem_limit_bytes=VMEM_LIMIT),
    )(*operands)

    if Mp != M or Np != N:
        out = out[:M, :N]
    return out


# ---------------------------------------------------------------------------
# Fused (x + pos_embed) -> LayerNorm  (used for ln_pre in the image encoder)
# ---------------------------------------------------------------------------

def _add_layernorm_kernel(x_ref, p_ref, g_ref, b_ref, o_ref, *, eps):
    xf = x_ref[0].astype(jnp.float32) + p_ref[...].astype(jnp.float32)
    mean = jnp.mean(xf, axis=-1, keepdims=True)
    d = xf - mean
    var = jnp.mean(d * d, axis=-1, keepdims=True)
    y = d * lax.rsqrt(var + eps)
    y = y * g_ref[...].astype(jnp.float32) + b_ref[...].astype(jnp.float32)
    o_ref[0] = y.astype(o_ref.dtype)


def pallas_add_layernorm(x, pos, gamma, beta, eps=1e-5):
    """LN(x + pos) over the last dim.  x:(B,Sp,D)  pos:(Sp,D)."""
    B, Sp, D = x.shape
    return pl.pallas_call(
        functools.partial(_add_layernorm_kernel, eps=eps),
        grid=(B,),
        in_specs=[pl.BlockSpec((1, Sp, D), lambda b: (b, 0, 0)),
                  pl.BlockSpec((Sp, D), lambda b: (0, 0)),
                  pl.BlockSpec((1, D), lambda b: (0, 0)),
                  pl.BlockSpec((1, D), lambda b: (0, 0))],
        out_specs=pl.BlockSpec((1, Sp, D), lambda b: (b, 0, 0)),
        out_shape=jax.ShapeDtypeStruct((B, Sp, D), x.dtype),
        compiler_params=pltpu.CompilerParams(
            dimension_semantics=("parallel",),
            vmem_limit_bytes=VMEM_LIMIT),
    )(x, pos, gamma.reshape(1, D), beta.reshape(1, D))


# ---------------------------------------------------------------------------
# Multi-head attention: heads live on the grid (grid = (B, H)); no lane-axis
# head slicing, no explicit K transpose, EUP reciprocal in the softmax.
# ---------------------------------------------------------------------------

def _attention_kernel(q_ref, k_ref, v_ref, o_ref, *, s_true, causal, sm_scale):
    q = q_ref[0, 0]                              # (Sp, Dh)
    kk = k_ref[0, 0]
    vv = v_ref[0, 0]
    Sp = q.shape[0]

    # scores: contract the Dh axes directly (transpose folded into MXU feed)
    s = lax.dot_general(q, kk, (((1,), (1,)), ((), ())),
                        preferred_element_type=jnp.float32) * sm_scale

    row = lax.broadcasted_iota(jnp.int32, (Sp, Sp), 0)
    col = lax.broadcasted_iota(jnp.int32, (Sp, Sp), 1)
    mask = col < s_true                          # mask padded key positions
    if causal:
        mask = jnp.logical_and(mask, col <= row)
    s = jnp.where(mask, s, -1e30)

    # hand-rolled softmax: the divide goes to the EUP reciprocal slot
    m = jnp.max(s, axis=-1, keepdims=True)
    e = jnp.exp(s - m)
    p = e * pl.reciprocal(jnp.sum(e, axis=-1, keepdims=True), approx=True)

    o = jnp.dot(p.astype(vv.dtype), vv, preferred_element_type=jnp.float32)
    o_ref[0, 0] = o.astype(o_ref.dtype)


def pallas_attention(q, k, v, *, s_true, causal):
    """q,k,v: (B, H, Sp, Dh) -> (B, H, Sp, Dh)."""
    B, H, Sp, Dh = q.shape
    spec = pl.BlockSpec((1, 1, Sp, Dh), lambda b, h: (b, h, 0, 0))
    kernel = functools.partial(_attention_kernel, s_true=s_true, causal=causal,
                               sm_scale=1.0 / math.sqrt(Dh))
    return pl.pallas_call(
        kernel,
        grid=(B, H),
        in_specs=[spec, spec, spec],
        out_specs=spec,
        out_shape=jax.ShapeDtypeStruct((B, H, Sp, Dh), q.dtype),
        compiler_params=pltpu.CompilerParams(
            dimension_semantics=("parallel", "parallel"),
            vmem_limit_bytes=VMEM_LIMIT),
    )(q, k, v)


# ---------------------------------------------------------------------------
# L2 normalize (text features, done once) + fused CLIP logits
# ---------------------------------------------------------------------------

def _l2norm_kernel(x_ref, o_ref):
    xf = x_ref[...].astype(jnp.float32)
    o_ref[...] = (xf * lax.rsqrt(jnp.sum(xf * xf, axis=-1, keepdims=True)
                                 + 1e-12)).astype(o_ref.dtype)


def pallas_l2_normalize(x):
    M, D = x.shape
    return pl.pallas_call(
        _l2norm_kernel,
        out_shape=jax.ShapeDtypeStruct((M, D), jnp.float32),
        in_specs=[pl.BlockSpec(memory_space=pltpu.MemorySpace.VMEM)],
        out_specs=pl.BlockSpec(memory_space=pltpu.MemorySpace.VMEM),
        compiler_params=pltpu.CompilerParams(vmem_limit_bytes=VMEM_LIMIT),
    )(x)


def _clip_logits_kernel(i_ref, t_ref, s_ref, o_ref):
    iv = i_ref[...].astype(jnp.float32)
    inorm = iv * lax.rsqrt(jnp.sum(iv * iv, axis=-1, keepdims=True) + 1e-12)
    scale = jnp.exp(s_ref[0, 0])
    logits = lax.dot_general(inorm, t_ref[...], (((1,), (1,)), ((), ())),
                             preferred_element_type=jnp.float32)
    o_ref[...] = (scale * logits).astype(o_ref.dtype)


def pallas_clip_logits(image_features, text_features_norm, logit_scale):
    """logit_scale.exp() * normalize(img) @ text_norm.T  (lane-dense output)."""
    B, D = image_features.shape
    C = text_features_norm.shape[0]
    Bp = max(8, _round_up(B, 8))
    Cp = _round_up(C, 128)                        # lane-dense (Bp, Cp) store
    img = jnp.pad(image_features, ((0, Bp - B), (0, 0)))
    txt = jnp.pad(text_features_norm, ((0, Cp - C), (0, 0)))
    scale_arr = jnp.asarray(logit_scale, jnp.float32).reshape(1, 1)
    out = pl.pallas_call(
        _clip_logits_kernel,
        out_shape=jax.ShapeDtypeStruct((Bp, Cp), jnp.float32),
        in_specs=[pl.BlockSpec(memory_space=pltpu.MemorySpace.VMEM),
                  pl.BlockSpec(memory_space=pltpu.MemorySpace.VMEM),
                  pl.BlockSpec(memory_space=pltpu.MemorySpace.SMEM)],
        out_specs=pl.BlockSpec(memory_space=pltpu.MemorySpace.VMEM),
        compiler_params=pltpu.CompilerParams(vmem_limit_bytes=VMEM_LIMIT),
    )(img, txt, scale_arr)
    return out[:B, :C]


# ---------------------------------------------------------------------------
# Transformer building blocks (glue around the fused Pallas kernels)
# ---------------------------------------------------------------------------

def residual_attention_block(x, p, causal, s_true):
    # CLIP ResidualAttentionBlock: x + attn(ln1(x)); x + mlp(ln2(x))
    B, Sp, D = x.shape
    H = p["attn"]["n_heads"]
    Dh = D // H
    x2 = x.reshape(B * Sp, D)

    # (1) fused ln1 + in_proj -> packed qkv
    qkv = pallas_linear(x2, p["attn"]["in_proj_w"], p["attn"]["in_proj_b"],
                        ln_params=(p["ln1_g"], p["ln1_b"]))
    # heads become a batch axis (layout plumbing done in XLA, not the kernel)
    qkv = qkv.reshape(B, Sp, 3, H, Dh).transpose(2, 0, 3, 1, 4)  # (3,B,H,Sp,Dh)
    q, k, v = qkv[0], qkv[1], qkv[2]

    # (2) attention over grid=(B, H)
    attn = pallas_attention(q, k, v, s_true=s_true, causal=causal)
    attn = attn.transpose(0, 2, 1, 3).reshape(B * Sp, D)

    # (3) out_proj fused with the residual add
    x2 = pallas_linear(attn, p["attn"]["out_proj_w"], p["attn"]["out_proj_b"],
                       residual=x2)

    # (4) fused ln2 + mlp_fc + QuickGELU
    h = pallas_linear(x2, p["mlp_fc_w"], p["mlp_fc_b"],
                      activation="quick_gelu",
                      ln_params=(p["ln2_g"], p["ln2_b"]))

    # (5) mlp_proj fused with the residual add
    x2 = pallas_linear(h, p["mlp_proj_w"], p["mlp_proj_b"], residual=x2)
    return x2.reshape(B, Sp, D)


# ---------------------------------------------------------------------------
# CLIP image encoder (ViT), PromptLearner, TextEncoder, CustomCLIP
# ---------------------------------------------------------------------------

def image_encoder(image, p):
    # image: (B, C, H, W) NCHW, cast to model dtype (like image.type(dtype))
    image = image.astype(ACT_DTYPE)
    B, C, H, W = image.shape
    P = p["patch_size"]
    gh, gw = H // P, W // P
    width = p["width"]

    # patch-embedding conv (stride = kernel = P, no bias) as a matmul
    patches = image.reshape(B, C, gh, P, gw, P).transpose(0, 2, 4, 1, 3, 5)
    patches = patches.reshape(B * gh * gw, C * P * P)
    x = pallas_linear(patches, p["conv_w"])                        # no bias
    x = x.reshape(B, gh * gw, width)

    cls = jnp.broadcast_to(p["class_embedding"].reshape(1, 1, width),
                           (B, 1, width)).astype(ACT_DTYPE)
    x = jnp.concatenate([cls, x], axis=1)                          # (B, S, width)

    S = x.shape[1]
    Sp = _round_up(S, 8)                                           # pad seq to 8
    x = jnp.pad(x, ((0, 0), (0, Sp - S), (0, 0)))
    pos = jnp.pad(p["pos_embed"].astype(ACT_DTYPE), ((0, Sp - S), (0, 0)))

    # fused pos_embed add + ln_pre (saves one HBM round-trip of the activation)
    x = pallas_add_layernorm(x, pos, p["ln_pre_g"], p["ln_pre_b"])

    for blk in p["blocks"]:
        x = residual_attention_block(x, blk, causal=False, s_true=S)

    cls_tok = x[:, 0, :]                                           # (B, width)
    # fused ln_post + visual projection
    feats = pallas_linear(cls_tok, p["proj"],
                          ln_params=(p["ln_post_g"], p["ln_post_b"]))
    return feats                                                   # (B, embed_dim)


def prompt_learner_forward(p):
    # class_token_position == 'end': [prefix, ctx, suffix]
    ctx = p["ctx"]                                                 # (n_ctx, D)
    n_cls = p["token_prefix"].shape[0]
    ctx = jnp.broadcast_to(ctx[None], (n_cls,) + ctx.shape)
    return jnp.concatenate([p["token_prefix"], ctx, p["token_suffix"]], axis=1)


def text_encoder(prompts, tokenized_prompts, p):
    # prompts: (n_cls, n_tok, D)
    x = prompts + p["pos_embed"][None]
    n_cls, S, D = x.shape
    Sp = _round_up(S, 8)
    if Sp != S:
        x = jnp.pad(x, ((0, 0), (0, Sp - S), (0, 0)))

    for blk in p["blocks"]:
        x = residual_attention_block(x, blk, causal=True, s_true=S)
    x = x[:, :S]

    # EOT token position (CLIP: EOT id 49407 is the max token id)
    eot = jnp.argmax(tokenized_prompts, axis=-1)
    feats_pre = x[jnp.arange(n_cls), eot]                          # (n_cls, D)
    # fused ln_final + text projection (LN is row-wise, so select-then-LN
    # equals LN-then-select)
    feats = pallas_linear(feats_pre, p["text_projection"],
                          ln_params=(p["ln_final_g"], p["ln_final_b"]))
    return feats                                                   # (n_cls, embed)


def custom_clip_forward(image, params):
    image_features = image_encoder(image, params["visual"])
    prompts = prompt_learner_forward(params["prompt"])
    text_features = text_encoder(prompts, params["tokenized_prompts"],
                                 params["text"])
    text_features_n = pallas_l2_normalize(text_features)   # normalize once
    logits = pallas_clip_logits(image_features, text_features_n,
                                params["logit_scale"])
    return logits


# ---------------------------------------------------------------------------
# Deterministic synthetic parameter initialization (bf16 storage)
# ---------------------------------------------------------------------------

def _init_block(key, width, heads, std=0.02):
    ks = jax.random.split(key, 6)
    hidden = 4 * width
    rn = lambda k, s: (std * jax.random.normal(k, s, jnp.float32)).astype(ACT_DTYPE)
    return {
        "ln1_g": jnp.ones((width,), ACT_DTYPE),
        "ln1_b": jnp.zeros((width,), ACT_DTYPE),
        "ln2_g": jnp.ones((width,), ACT_DTYPE),
        "ln2_b": jnp.zeros((width,), ACT_DTYPE),
        "attn": {
            "n_heads": heads,
            "in_proj_w": rn(ks[0], (width, 3 * width)),
            "in_proj_b": jnp.zeros((3 * width,), ACT_DTYPE),
            "out_proj_w": rn(ks[1], (width, width)),
            "out_proj_b": jnp.zeros((width,), ACT_DTYPE),
        },
        "mlp_fc_w": rn(ks[2], (width, hidden)),
        "mlp_fc_b": jnp.zeros((hidden,), ACT_DTYPE),
        "mlp_proj_w": rn(ks[3], (hidden, width)),
        "mlp_proj_b": jnp.zeros((width,), ACT_DTYPE),
    }


def init_params(key):
    # small synthetic CLIP
    img_size, patch, in_ch = 16, 8, 3
    v_width, v_heads, v_layers = 64, 4, 2
    embed_dim = 64
    ctx_dim, t_heads, t_layers = 64, 4, 2
    n_tok, n_cls, n_ctx = 8, 3, 2
    std = 0.02

    keys = jax.random.split(key, 16)
    n_patches = (img_size // patch) ** 2
    rn = lambda k, s: (std * jax.random.normal(k, s, jnp.float32)).astype(ACT_DTYPE)

    visual = {
        "patch_size": patch,
        "width": v_width,
        "conv_w": rn(keys[0], (in_ch * patch * patch, v_width)),
        "class_embedding": rn(keys[1], (v_width,)),
        "pos_embed": rn(keys[2], (n_patches + 1, v_width)),
        "ln_pre_g": jnp.ones((v_width,), ACT_DTYPE),
        "ln_pre_b": jnp.zeros((v_width,), ACT_DTYPE),
        "ln_post_g": jnp.ones((v_width,), ACT_DTYPE),
        "ln_post_b": jnp.zeros((v_width,), ACT_DTYPE),
        "proj": rn(keys[3], (v_width, embed_dim)),
        "blocks": [_init_block(k, v_width, v_heads)
                   for k in jax.random.split(keys[4], v_layers)],
    }

    text = {
        "pos_embed": rn(keys[5], (n_tok, ctx_dim)),
        "ln_final_g": jnp.ones((ctx_dim,), ACT_DTYPE),
        "ln_final_b": jnp.zeros((ctx_dim,), ACT_DTYPE),
        "text_projection": rn(keys[6], (ctx_dim, embed_dim)),
        "blocks": [_init_block(k, ctx_dim, t_heads)
                   for k in jax.random.split(keys[7], t_layers)],
    }

    # PromptLearner buffers: token_prefix (SOS embedding), ctx vectors, suffix.
    # TODO(synk): real CLIP tokenization/_Tokenizer + token_embedding lookup is
    # a string op with no Pallas equivalent; synthetic embeddings/ids are used.
    prompt = {
        "ctx": rn(keys[8], (n_ctx, ctx_dim)),
        "token_prefix": rn(keys[9], (n_cls, 1, ctx_dim)),
        "token_suffix": rn(keys[10], (n_cls, n_tok - 1 - n_ctx, ctx_dim)),
    }

    # synthetic tokenized prompts: SOS=49406 at pos 0, EOT=49407 afterwards
    name_lens = [1, 2, 3]
    toks = []
    for i in range(n_cls):
        row = [49406] + [400 + j for j in range(n_ctx + name_lens[i])]
        row = row + [49407] + [0] * (n_tok - len(row) - 1)
        toks.append(row[:n_tok])
    tokenized_prompts = jnp.asarray(toks, dtype=jnp.int32)

    return {
        "visual": visual,
        "text": text,
        "prompt": prompt,
        "tokenized_prompts": tokenized_prompts,
        "logit_scale": jnp.asarray(math.log(1.0 / 0.07), jnp.float32),
    }


# ---------------------------------------------------------------------------

if __name__ == "__main__":
    key = jax.random.PRNGKey(0)
    pkey, ikey = jax.random.split(key)
    params = init_params(pkey)

    # image: (batch=2, channels=3, H=16, W=16), NCHW like PyTorch
    image = jax.random.normal(ikey, (2, 3, 16, 16), jnp.float32)

    logits = custom_clip_forward(image, params)
    logits = jax.block_until_ready(logits)

    assert logits.shape == (2, 3), logits.shape
    assert bool(jnp.all(jnp.isfinite(logits)))
    print("KERNEL_OK")
</pallas_src>

<mosaic_0001>
module attributes {stable_mosaic.version = 11 : i64} {
  func.func @_linear_kernel(%arg0: i32, %arg1: i32, %arg2: i32, %arg3: memref<8x192xbf16, #tpu.memory_space<vmem>>, %arg4: memref<192x128xbf16, #tpu.memory_space<vmem>>, %arg5: memref<8x128xbf16, #tpu.memory_space<vmem>>) attributes {dimension_semantics = [#tpu.dimension_semantics<parallel>, #tpu.dimension_semantics<parallel>, #tpu.dimension_semantics<arbitrary>], iteration_bounds = array<i64: 1, 1, 1>, scalar_prefetch = 0 : i64, scratch_operands = 0 : i64, tpu.core_type = #tpu.core_type<tc>, window_params = [{transform_indices = @transform_0, window_bounds = array<i64: 8, 192>}, {transform_indices = @transform_1, window_bounds = array<i64: 192, 128>}, {transform_indices = @transform_2, window_bounds = array<i64: 8, 128>}]} {
    %c0 = arith.constant 0 : index
    %c0_0 = arith.constant 0 : index
    %0 = vector.load %arg3[%c0, %c0_0] : memref<8x192xbf16, #tpu.memory_space<vmem>>, vector<8x192xbf16>
    %c0_1 = arith.constant 0 : index
    %c0_2 = arith.constant 0 : index
    %1 = vector.load %arg4[%c0_1, %c0_2] : memref<192x128xbf16, #tpu.memory_space<vmem>>, vector<192x128xbf16>
    %cst = arith.constant dense<0.000000e+00> : vector<8x128xf32>
    %2 = tpu.matmul %0, %1, %cst {dimension_numbers = #tpu.dot_dimension_numbers<[1], [0], [0], [1], [0, 0, 1, 1], [], []>} : vector<8x192xbf16>, vector<192x128xbf16>, vector<8x128xf32> -> vector<8x128xf32>
    %3 = arith.truncf %2 : vector<8x128xf32> to vector<8x128xbf16>
    %c0_3 = arith.constant 0 : index
    %c0_4 = arith.constant 0 : index
    %4 = vector.load %arg5[%c0_3, %c0_4] : memref<8x128xbf16, #tpu.memory_space<vmem>>, vector<8x128xbf16>
    tpu.vector_store %arg5[%c0_3, %c0_4], %3 {strides = array<i32>} : memref<8x128xbf16, #tpu.memory_space<vmem>>, vector<8x128xbf16>,
    return
  }
  func.func @transform_0(%arg0: i32, %arg1: i32, %arg2: i32) -> (i32, i32) {
    %c0_i32 = arith.constant 0 : i32
    return %arg0, %arg2 : i32, i32
  }
  func.func @transform_1(%arg0: i32, %arg1: i32, %arg2: i32) -> (i32, i32) {
    %c0_i32 = arith.constant 0 : i32
    return %arg2, %arg1 : i32, i32
  }
  func.func @transform_2(%arg0: i32, %arg1: i32, %arg2: i32) -> (i32, i32) {
    %c0_i32 = arith.constant 0 : i32
    return %arg0, %arg1 : i32, i32
  }
}

</mosaic_0001>

<bundles_post_ra>
// kernel: tpu_custom_call.1
= control target key start
LH: loop header
LB: loop body
LE: loop exit
PB: predicated region body
PF: predicated region fallthrough
CT: control target
= control target key end

     0   :  { %7 = vsyncpa [#allocation3], 0  ;;  %s335_s0 = inlined_call_operand.hbm [shape: bf16[8,192], index: 0, kind: input, shape index: {}]   ;;  %s336_s1 = inlined_call_operand.hbm [shape: bf16[192,128], index: 1, kind: input, shape index: {}]   ;;  %s337_s2 = inlined_call_operand.hbm [shape: bf16[8,128], index: 2, kind: output, shape index: {}]  }
   0x1   :  { %8 = vsyncpa [#allocation6], 0 }
   0x2   :  { %9 = vsyncpa [#allocation4], 0  ;;  %s305_s9 = smov [#allocation2]   ;;  %s306_s11 = smov [#allocation5]  }
   0x3   :  { %s16_s10 = sshll.u32 %s305_s9, 4  ;;  %s25_s12 = sshll.u32 %s306_s11, 4  ;;  %s17_s10 = int_to_ptr.vmem [resolvable:$true] %s16_s10  ;;  %s26_s12 = int_to_ptr.vmem [resolvable:$true] %s25_s12 }
   0x4   :  { %s247_s13 = scalar_lea.vmem %s17_s10, 128  ;;  %p252_p1 = scmp.lt.s32.totalorder %s17_s10, %s17_s10 }
   0x5   :  { %p248_p0 = scmp.ne.s32.totalorder %s17_s10, %s247_s13  ;;  %p253_p2 = scmp.lt.s32.totalorder %s247_s13, %s247_s13 }
   0x7   :  { %p254_p3 = por %p253_p2, %p252_p1 }
   0x9   :  { %p255_p4 = pnand %p254_p3, %p248_p0 }
   0xb   :  { %258 = shalt.err (!%p255_p4)
}
   0xc   :  { %19 = dma.hbm_to_vmem [thread:$0]  %s335_s0, 128, %s17_s10, [#allocation3]  }
   0xd   :  { %s267_s16 = scalar_lea.vmem %s26_s12, 1536  ;;  %p272_p6 = scmp.lt.s32.totalorder %s26_s12, %s26_s12 }
   0xe   :  { %p268_p5 = scmp.ne.s32.totalorder %s26_s12, %s267_s16  ;;  %p273_p7 = scmp.lt.s32.totalorder %s267_s16, %s267_s16 }
  0x10   :  { %p274_p8 = por %p273_p7, %p272_p6 }
  0x12   :  { %p275_p9 = pnand %p274_p8, %p268_p5 }
  0x14   :  { %278 = shalt.err (!%p275_p9)
}
  0x15   :  { %s307_s17 = smov 64   ;;  %s308_s18 = smov 4  }
  0x16   :  { %31 = dma.hbm_to_vmem [thread:$0]  %s336_s1, 1536, %s26_s12, [#allocation6], %s307_s17, %s307_s17, %s308_s18  }
  0x17   :  { %299 = dma.done.wait [#allocation3], 128  }
  0x18   :  { %300 = vsyncadd [#allocation3], 4294967168 }
  0x19   :  { %301 = dma.done.wait [#allocation6], 1536  }
  0x1a   :  { %302 = vsyncadd [#allocation6], 4294965760  ;;  %v309_v0 = vmov 0   ;;  %v225_v1 = vld [vmem:[#allocation5 + $0x38] sm:$0xff]   ;;  %v226_v2 = vld [vmem:[#allocation5 + $0x30] sm:$0xff]   ;;  %vm142_vm0 = vcmask 523264  }
  0x1b   :  { %146 = vmatprep.subr.bf16.mxu0 %v309_v0  ;;  %v227_v3 = vld [vmem:[#allocation5 + $0x28] sm:$0xff]   ;;  %v228_v4 = vld [vmem:[#allocation5 + $0x20] sm:$0xff]   ;;  %v39_v5 = vld [vmem:[#allocation2] sm:$0xff]  ;;  %s310_s0 = smov [#allocation7]  }
  0x1c   :  { %147 = vmatpush1.bf16.msra.mxu0 %v225_v1  ;;  %v205_v6 = vcombine.high %v39_v5, %v39_v5  ;;  %v229_v7 = vld [vmem:[#allocation5 + $0x18] sm:$0xff]   ;;  %v230_v8 = vld [vmem:[#allocation5 + $0x10] sm:$0xff]   ;;  %v231_v9 = vld [vmem:[#allocation5 + $0x8] sm:$0xff]   ;;  %v204_v15 = vcombine.low %v39_v5, %v39_v5  ;;  %s194_s1 = sshll.u32 %s310_s0, 4  ;;  %s195_s1 = int_to_ptr.vmem [resolvable:$true] %s194_s1 }
  0x1d   :  { %148 = vmatprep.subr.bf16.mxu0 %v309_v0  ;;  %v232_v10 = vld [vmem:[#allocation5] sm:$0xff]   ;;  %v233_v11 = vld [vmem:[#allocation5 + $0x58] sm:$0xff]   ;;  %v234_v12 = vld [vmem:[#allocation5 + $0x50] sm:$0xff]   ;;  %s279_s21 = scalar_lea.vmem %s195_s1, 64  ;;  %p284_p11 = scmp.lt.s32.totalorder %s195_s1, %s195_s1 }
  0x1e   :  { %218 = vmatprep.mubr.msk.bf16.mxu0 %vm142_vm0, %v205_v6  ;;  %v235_v13 = vld [vmem:[#allocation5 + $0x48] sm:$0xff]   ;;  %v236_v14 = vld [vmem:[#allocation5 + $0x40] sm:$0xff]   ;;  %p280_p10 = scmp.ne.s32.totalorder %s195_s1, %s279_s21  ;;  %p285_p12 = scmp.lt.s32.totalorder %s279_s21, %s279_s21 }
  0x20   :  { %149 = vmatpush1.bf16.msra.mxu0 %v226_v2  ;;  %p286_p13 = por %p285_p12, %p284_p11 }
  0x21   :  { %150 = vmatprep.subr.bf16.mxu0 %v309_v0 }
  0x22   :  { %p287_p0 = pnand %p286_p13, %p280_p10 }
  0x24   :  { %151 = vmatpush1.bf16.msra.mxu0 %v227_v3 }
  0x25   :  { %152 = vmatprep.subr.bf16.mxu0 %v309_v0 }
  0x28   :  { %153 = vmatpush1.bf16.msra.mxu0 %v228_v4 }
  0x29   :  { %154 = vmatprep.subr.bf16.mxu0 %v309_v0 }
  0x2c   :  { %155 = vmatpush1.bf16.msra.mxu0 %v229_v7 }
  0x2d   :  { %156 = vmatprep.subr.bf16.mxu0 %v309_v0 }
  0x30   :  { %157 = vmatpush1.bf16.msra.mxu0 %v230_v8 }
  0x31   :  { %158 = vmatprep.subr.bf16.mxu0 %v309_v0 }
  0x34   :  { %159 = vmatpush1.bf16.msra.mxu0 %v231_v9 }
  0x35   :  { %160 = vmatprep.subr.bf16.mxu0 %v309_v0 }
  0x38   :  { %161 = vmatpush1.bf16.msra.mxu0 %v232_v10 }
  0x39   :  { %170 = vmatprep.subr.bf16.mxu0 %v309_v0 }
  0x3c   :  { %171 = vmatpush2.bf16.msra.mxu0 %v233_v11 }
  0x3d   :  { %172 = vmatprep.subr.bf16.mxu0 %v309_v0 }
  0x40   :  { %173 = vmatpush2.bf16.msra.mxu0 %v234_v12 }
  0x41   :  { %174 = vmatprep.subr.bf16.mxu0 %v309_v0 }
  0x44   :  { %175 = vmatpush2.bf16.msra.mxu0 %v235_v13 }
  0x45   :  { %176 = vmatprep.subr.bf16.mxu0 %v309_v0 }
  0x48   :  { %177 = vmatpush2.bf16.msra.mxu0 %v236_v14 }
  0x4b   :  { %179 = vmatmul.mubr.bf16.vlgmr.msra.gmra.mxu0 %v204_v15 }
 0x10b   :  { %v180_v16 = vpop.f32.mrf.mxu0 }
 0x10c   :  { %v186_v17 = vpack.c.bf16 %v180_v16, %v180_v16 }
 0x10d   :  { %v182_v18 = vpop.f32.mrf.mxu0 }
 0x10e   :  { %187 = vst [vmem:[#allocation7] sm:$0xf] %v186_v17 }
 0x10f   :  { %v183_v19 = vpop.f32.mrf.mxu0 }
 0x110   :  { %290 = shalt.err (!%p287_p0)
}
 0x111   :  { %197 = dma.vmem_to_hbm [thread:$0]  %s195_s1, 64, %s337_s2, [#allocation4]   ;;  %v184_v20 = vpop.f32.mrf.mxu0 }
 0x112   :  { %303 = dma.done.wait [#allocation4], 64  }
 0x113   :  { %304 = vsyncadd [#allocation4], 4294967232 }
 0x114   :  { %201 = vsyncpa [#allocation3], 1 }
 0x115   :  { %202 = vsyncpa [#allocation6], 1 }
 0x116   :  { %203 = vsyncpa [#allocation4], 1 }

</bundles_post_ra>
